<compile_context>
chip_gen: v5e
topology: v5e:2x2
jax: 0.10.0
libtpu: 0.0.40
codegen_flags: <defaults>
</compile_context>

<pallas_src>
from functools import partial

import jax
import jax.numpy as jnp
from jax import lax
from jax.experimental import pallas as pl
from jax.experimental.pallas import tpu as pltpu


def _choose_tiling(P):
    """Pad P to a lane multiple and pick a lane-dense pixel tile.

    TP = largest multiple-of-128 divisor of Ppad that is <= 512 and still leaves
    >= 2 tiles (so the accumulation axis pipelines and, for B == 1, can be split
    across v7x's two TensorCores).  Falls back to a single 128-wide tile.
    """
    Ppad = -(-P // 128) * 128
    cands = [c for c in (512, 384, 256, 128) if Ppad % c == 0]
    tp = next((c for c in cands if Ppad // c >= 2), cands[-1])
    nP = Ppad // tp
    n_split = 2 if (nP >= 2 and nP % 2 == 0) else 1
    return Ppad, tp, nP // n_split, n_split


def _fused_kernel(pcoord_ref, flow_ref, src_ref, dst_ref, tgt_ref, out_ref, *, H, W):
    """grid = (B, n_split, tiles_per_split).  out_ref is an (8, TP) partial-sum block.

    row 0: sum |dst - warp(src, flow)|        (L1 photometric)
    row 1: sum (dst - warp(src, flow))^2      (MSE photometric)
    row 2: sum_p ||target - flow||_2          (EPE)
    """
    t = pl.program_id(2)
    TP = out_ref.shape[-1]
    C = src_ref.shape[0] // H

    @pl.when(t == 0)
    def _init():
        out_ref[...] = jnp.zeros_like(out_ref)

    ff = flow_ref[...].astype(jnp.float32)                 # (2, TP) lane-dense flow tile
    pc = pcoord_ref[...]                                   # (2, TP) output-pixel (row, col)
    yc = ff[0:1, :] + pc[0:1, :]                           # absolute sample row
    xc = ff[1:2, :] + pc[1:2, :]                           # absolute sample col

    # Separable bilinear "tent" weights: O((H + W) * TP) VALU work.  Out-of-range
    # coordinates (incl. padded output pixels) get all-zero weights -> zero padding.
    row = lax.broadcasted_iota(jnp.int32, (H, TP), 0).astype(jnp.float32)
    col = lax.broadcasted_iota(jnp.int32, (W, TP), 0).astype(jnp.float32)
    wy = jnp.maximum(1.0 - jnp.abs(row - yc), 0.0)         # (H, TP)
    wx = jnp.maximum(1.0 - jnp.abs(col - xc), 0.0)         # (W, TP)

    # x-interpolation on the MXU: (C*H, W) @ (W, TP) -> (C*H, TP).
    xint = jnp.dot(src_ref[...].astype(jnp.float32), wx,
                   preferred_element_type=jnp.float32)
    # y-interpolation: wy-weighted H-tap reduce on the VPU/XLU.
    # (reshape splits the sublane axis only; free when H % 8 == 0)
    warp = jnp.sum(xint.reshape(C, H, TP) * wy[None, :, :], axis=1)     # (C, TP)

    diff = dst_ref[...].astype(jnp.float32) - warp
    out_ref[0:1, :] += jnp.sum(jnp.abs(diff), axis=0, keepdims=True)    # L1 partials
    out_ref[1:2, :] += jnp.sum(diff * diff, axis=0, keepdims=True)      # MSE partials

    d = tgt_ref[...].astype(jnp.float32) - ff                           # (2, TP)
    out_ref[2:3, :] += jnp.sqrt(jnp.sum(d * d, axis=0, keepdims=True))  # EPE partials


def _fused_sums(src, flow, dst, target):
    """Returns (abs_sum, sq_sum, epe_sum) as f32 scalars (sums over all real pixels)."""
    B, C, H, W = src.shape
    assert flow.shape == (B, 2, H, W) and dst.shape == src.shape
    assert target.shape == (B, 2, H, W)
    P = H * W
    Ppad, TP, npt, n_split = _choose_tiling(P)
    pad = Ppad - P

    # Output-pixel (row, col) coordinates, precomputed once (no in-kernel div/mod).
    # Padded pixels get an out-of-range coordinate so all their tent weights are zero.
    rows = (jnp.arange(P, dtype=jnp.int32) // W).astype(jnp.float32)
    cols = (jnp.arange(P, dtype=jnp.int32) % W).astype(jnp.float32)
    pcoord = jnp.stack([rows, cols], axis=0)                    # (2, P) f32
    if pad:
        pcoord = jnp.pad(pcoord, ((0, 0), (0, pad)),
                         constant_values=-4.0 * (H + W))

    def flat_pad(x):                                            # keep native dtype
        x = x.reshape(B, x.shape[1], P)
        return jnp.pad(x, ((0, 0), (0, 0), (0, pad))) if pad else x

    flow_p = flat_pad(flow)                                     # (B, 2, Ppad)
    dst_p = flat_pad(dst)                                       # (B, C, Ppad)
    tgt_p = flat_pad(target)                                    # (B, 2, Ppad)
    src2d = src.reshape(B, C * H, W)                            # (B, C*H, W), resident block

    # Honest VMEM accounting (bytes, f32 words): double-buffered resident src, the
    # double-buffered per-step tiles + output block, and the live in-kernel temporaries
    # (wx, wy, the (C*H, TP) x-interpolated block, warp/diff).  Only override the scoped
    # limit when we might exceed the smallest per-generation default (16 MiB on v5e).
    est = 4 * (2 * (C * H * W)
               + 2 * ((2 + 2 + C + 2 + 8) * TP)
               + (H + W + C * H + 4 * C + 8) * TP)
    vmem_limit = (int(min(max(2 * est, 16 << 20), 64 << 20))
                  if est > (8 << 20) else None)

    out = pl.pallas_call(
        partial(_fused_kernel, H=H, W=W),
        out_shape=jax.ShapeDtypeStruct((B, n_split, 8, TP), jnp.float32),
        grid_spec=pltpu.PrefetchScalarGridSpec(
            num_scalar_prefetch=0,
            grid=(B, n_split, npt),
            in_specs=[
                pl.BlockSpec((2, TP), lambda b, s, t: (0, s * npt + t)),            # pixel coords
                pl.BlockSpec((None, 2, TP), lambda b, s, t: (b, 0, s * npt + t)),   # flow tile
                pl.BlockSpec((None, C * H, W), lambda b, s, t: (b, 0, 0)),          # src, resident
                pl.BlockSpec((None, C, TP), lambda b, s, t: (b, 0, s * npt + t)),   # dst tile
                pl.BlockSpec((None, 2, TP), lambda b, s, t: (b, 0, s * npt + t)),   # target tile
            ],
            out_specs=pl.BlockSpec((None, None, 8, TP), lambda b, s, t: (b, s, 0, 0)),
        ),
        compiler_params=pltpu.CompilerParams(
            dimension_semantics=("parallel", "parallel", "arbitrary"),
            vmem_limit_bytes=vmem_limit,
        ),
    )(pcoord, flow_p, src2d, dst_p, tgt_p)

    totals = jnp.sum(out, axis=(0, 1, 3))          # tiny reduction of lane-dense partials
    return totals[0], totals[1], totals[2]


def _gradient_loss(flow, smooth_coef=0.01):
    # O(P) elementwise + reduce: cheap in plain XLA, keeps the kernel's pipeline clean.
    f = flow.astype(jnp.float32)
    dy = f[:, :, 1:, :] - f[:, :, :-1, :]
    dx = f[:, :, :, 1:] - f[:, :, :, :-1]
    d = jnp.mean(dx * dx) + jnp.mean(dy * dy)
    return smooth_coef * d / 2.0


# -----------------------------------------------------------------------------
# MultiScale forward (mirrors the PyTorch module; no learnable params,
# loss_weights / div_flow are constants that forward() never uses).
# -----------------------------------------------------------------------------
class MultiScale:
    def __init__(self, startScale=4, numScales=5, l_weight=0.32, norm='L1'):
        self.startScale = startScale
        self.numScales = numScales
        self.loss_weights = jnp.asarray(
            [l_weight / 2 ** s for s in range(numScales)], jnp.float32)
        self.l_type = norm
        self.div_flow = 1
        assert self.loss_weights.shape[0] == self.numScales

    def forward(self, im1, im2, output, target):
        epevalue = 0.0
        if isinstance(output, tuple):
            flow = output[0]
            B, C, H, W = im1.shape
            # target is unused in this branch (reference semantics); reuse flow so the
            # kernel's EPE row is just an ignored zero.
            abs_sum, _sq, _epe = _fused_sums(im1, flow, im2, flow)
            pme = abs_sum / float(B * C * H * W)               # L1 photometric (mean)
            gd = _gradient_loss(flow, smooth_coef=0.01)        # L2 smoothness
            return [pme + gd, epevalue]
        else:
            # PyTorch indexes output[0] -> a single (2, H, W) flow; that only type-checks
            # when batch == 1, which we mirror here.
            assert im1.shape[0] == 1, "non-tuple branch requires batch == 1"
            flow = output[0][None]
            B, C, H, W = im1.shape
            _abs, sq_sum, epe_sum = _fused_sums(im1, flow, im2, target)
            epevalue = epe_sum / float(B * H * W)              # EPE (mean)
            pme = sq_sum / float(B * C * H * W)                # MSE photometric (mean)
            return [pme, epevalue]

    __call__ = forward


if __name__ == "__main__":
    key = jax.random.PRNGKey(0)
    k1, k2, k3, k4 = jax.random.split(key, 4)
    model = MultiScale(startScale=4, numScales=5, l_weight=0.32, norm='L1')

    # Tuple branch (L1 photometric + smoothness): B=2, P=256 -> TP=128, split=2.
    B, C, H, W = 2, 3, 16, 16
    im1 = jax.random.normal(k1, (B, C, H, W), jnp.float32)
    im2 = jax.random.normal(k2, (B, C, H, W), jnp.float32)
    flow = 2.0 * jax.random.normal(k3, (B, 2, H, W), jnp.float32)
    target = jax.random.normal(k4, (B, 2, H, W), jnp.float32)
    loss, _ = model.forward(im1, im2, (flow,), target)
    jax.block_until_ready(loss)

    # Non-tuple branch (MSE photometric + EPE), batch == 1: P=384 -> 3-step accumulation.
    B2, C2, H2, W2 = 1, 3, 24, 16
    im1b = jax.random.normal(k1, (B2, C2, H2, W2), jnp.float32)
    im2b = jax.random.normal(k2, (B2, C2, H2, W2), jnp.float32)
    flowb = 2.0 * jax.random.normal(k3, (B2, 2, H2, W2), jnp.float32)
    targetb = jax.random.normal(k4, (B2, 2, H2, W2), jnp.float32)
    loss2, epev2 = model.forward(im1b, im2b, flowb, targetb)
    jax.block_until_ready((loss2, epev2))

    # Non-lane-aligned spatial size (P=80 -> padded to 128) on the tuple branch.
    B3, C3, H3, W3 = 1, 2, 8, 10
    im1c = jax.random.normal(k1, (B3, C3, H3, W3), jnp.float32)
    im2c = jax.random.normal(k2, (B3, C3, H3, W3), jnp.float32)
    flowc = 2.0 * jax.random.normal(k3, (B3, 2, H3, W3), jnp.float32)
    loss3, _ = model.forward(im1c, im2c, (flowc,), flowc)
    jax.block_until_ready(loss3)

    print("KERNEL_OK")
</pallas_src>

<mosaic_0001>
module attributes {stable_mosaic.version = 11 : i64} {
  func.func @_fused_kernel(%arg0: i32, %arg1: i32, %arg2: i32, %arg3: memref<2x128xf32, #tpu.memory_space<vmem>>, %arg4: memref<1x2x128xf32, #tpu.memory_space<vmem>>, %arg5: memref<1x48x16xf32, #tpu.memory_space<vmem>>, %arg6: memref<1x3x128xf32, #tpu.memory_space<vmem>>, %arg7: memref<1x2x128xf32, #tpu.memory_space<vmem>>, %arg8: memref<1x1x8x128xf32, #tpu.memory_space<vmem>>) attributes {dimension_semantics = [#tpu.dimension_semantics<parallel>, #tpu.dimension_semantics<parallel>, #tpu.dimension_semantics<arbitrary>], iteration_bounds = array<i64: 2, 2, 1>, scalar_prefetch = 0 : i64, scratch_operands = 0 : i64, tpu.core_type = #tpu.core_type<tc>, window_params = [{transform_indices = @transform_0, window_bounds = array<i64: 2, 128>}, {transform_indices = @transform_1, window_bounds = array<i64: 1, 2, 128>}, {transform_indices = @transform_2, window_bounds = array<i64: 1, 48, 16>}, {transform_indices = @transform_3, window_bounds = array<i64: 1, 3, 128>}, {transform_indices = @transform_4, window_bounds = array<i64: 1, 2, 128>}, {transform_indices = @transform_5, window_bounds = array<i64: 1, 1, 8, 128>}]} {
    %c0_i32 = arith.constant 0 : i32
    %0 = arith.cmpi eq, %arg2, %c0_i32 : i32
    %1 = arith.extui %0 : i1 to i32
    %c0_i32_0 = arith.constant 0 : i32
    %2 = arith.cmpi ne, %1, %c0_i32_0 : i32
    scf.if %2 {
      %cst_44 = arith.constant 0.000000e+00 : f32
      %72 = vector.broadcast %cst_44 : f32 to vector<8x128xf32>
      %c0_45 = arith.constant 0 : index
      %c0_46 = arith.constant 0 : index
      %c0_47 = arith.constant 0 : index
      %c0_48 = arith.constant 0 : index
      %73 = vector.load %arg8[%c0_45, %c0_46, %c0_47, %c0_48] : memref<1x1x8x128xf32, #tpu.memory_space<vmem>>, vector<1x1x8x128xf32>
      %74 = vector.shape_cast %73 : vector<1x1x8x128xf32> to vector<8x128xf32>
      %75 = vector.shape_cast %72 : vector<8x128xf32> to vector<1x1x8x128xf32>
      tpu.vector_store %arg8[%c0_45, %c0_46, %c0_47, %c0_48], %75 {strides = array<i32>} : memref<1x1x8x128xf32, #tpu.memory_space<vmem>>, vector<1x1x8x128xf32>,
    } else {
    }
    %c0 = arith.constant 0 : index
    %c0_1 = arith.constant 0 : index
    %c0_2 = arith.constant 0 : index
    %3 = vector.load %arg4[%c0, %c0_1, %c0_2] : memref<1x2x128xf32, #tpu.memory_space<vmem>>, vector<1x2x128xf32>
    %4 = vector.shape_cast %3 : vector<1x2x128xf32> to vector<2x128xf32>
    %c0_3 = arith.constant 0 : index
    %c0_4 = arith.constant 0 : index
    %5 = vector.load %arg3[%c0_3, %c0_4] : memref<2x128xf32, #tpu.memory_space<vmem>>, vector<2x128xf32>
    %6 = vector.extract_strided_slice %4 {offsets = [0, 0], sizes = [1, 128], strides = [1, 1]} : vector<2x128xf32> to vector<1x128xf32>
    %7 = vector.extract_strided_slice %5 {offsets = [0, 0], sizes = [1, 128], strides = [1, 1]} : vector<2x128xf32> to vector<1x128xf32>
    %8 = arith.addf %6, %7 : vector<1x128xf32>
    %9 = vector.extract_strided_slice %4 {offsets = [1, 0], sizes = [1, 128], strides = [1, 1]} : vector<2x128xf32> to vector<1x128xf32>
    %10 = vector.extract_strided_slice %5 {offsets = [1, 0], sizes = [1, 128], strides = [1, 1]} : vector<2x128xf32> to vector<1x128xf32>
    %11 = arith.addf %9, %10 : vector<1x128xf32>
    %12 = tpu.iota {dimensions = array<i32: 0>} : vector<16x128xi32>
    %13 = arith.sitofp %12 : vector<16x128xi32> to vector<16x128xf32>
    %14 = tpu.iota {dimensions = array<i32: 0>} : vector<16x128xi32>
    %15 = arith.sitofp %14 : vector<16x128xi32> to vector<16x128xf32>
    %16 = vector.broadcast %8 : vector<1x128xf32> to vector<16x128xf32>
    %17 = arith.subf %13, %16 : vector<16x128xf32>
    %18 = math.absf %17 : vector<16x128xf32>
    %cst = arith.constant 1.000000e+00 : f32
    %19 = vector.broadcast %cst : f32 to vector<16x128xf32>
    %20 = arith.subf %19, %18 : vector<16x128xf32>
    %cst_5 = arith.constant 0.000000e+00 : f32
    %21 = vector.broadcast %cst_5 : f32 to vector<16x128xf32>
    %22 = arith.maximumf %20, %21 : vector<16x128xf32>
    %23 = vector.broadcast %11 : vector<1x128xf32> to vector<16x128xf32>
    %24 = arith.subf %15, %23 : vector<16x128xf32>
    %25 = math.absf %24 : vector<16x128xf32>
    %cst_6 = arith.constant 1.000000e+00 : f32
    %26 = vector.broadcast %cst_6 : f32 to vector<16x128xf32>
    %27 = arith.subf %26, %25 : vector<16x128xf32>
    %cst_7 = arith.constant 0.000000e+00 : f32
    %28 = vector.broadcast %cst_7 : f32 to vector<16x128xf32>
    %29 = arith.maximumf %27, %28 : vector<16x128xf32>
    %c0_8 = arith.constant 0 : index
    %c0_9 = arith.constant 0 : index
    %c0_10 = arith.constant 0 : index
    %30 = vector.load %arg5[%c0_8, %c0_9, %c0_10] : memref<1x48x16xf32, #tpu.memory_space<vmem>>, vector<1x48x16xf32>
    %31 = vector.shape_cast %30 : vector<1x48x16xf32> to vector<48x16xf32>
    %cst_11 = arith.constant dense<0.000000e+00> : vector<48x128xf32>
    %32 = tpu.matmul %31, %29, %cst_11 {dimension_numbers = #tpu.dot_dimension_numbers<[1], [0], [0], [1], [0, 0, 1, 1], [], []>} : vector<48x16xf32>, vector<16x128xf32>, vector<48x128xf32> -> vector<48x128xf32>
    %33 = vector.shape_cast %32 : vector<48x128xf32> to vector<3x16x128xf32>
    %34 = vector.shape_cast %22 : vector<16x128xf32> to vector<1x16x128xf32>
    %35 = vector.broadcast %34 : vector<1x16x128xf32> to vector<3x16x128xf32>
    %36 = arith.mulf %33, %35 : vector<3x16x128xf32>
    %cst_12 = arith.constant dense<0.000000e+00> : vector<3x128xf32>
    %37 = vector.multi_reduction <add>, %36, %cst_12 [1] : vector<3x16x128xf32> to vector<3x128xf32>
    %c0_13 = arith.constant 0 : index
    %c0_14 = arith.constant 0 : index
    %c0_15 = arith.constant 0 : index
    %38 = vector.load %arg6[%c0_13, %c0_14, %c0_15] : memref<1x3x128xf32, #tpu.memory_space<vmem>>, vector<1x3x128xf32>
    %39 = vector.shape_cast %38 : vector<1x3x128xf32> to vector<3x128xf32>
    %40 = arith.subf %39, %37 : vector<3x128xf32>
    %c0_16 = arith.constant 0 : index
    %c0_17 = arith.constant 0 : index
    %c0_18 = arith.constant 0 : index
    %c0_19 = arith.constant 0 : index
    %41 = vector.load %arg8[%c0_16, %c0_17, %c0_18, %c0_19] : memref<1x1x8x128xf32, #tpu.memory_space<vmem>>, vector<1x1x1x128xf32>
    %42 = vector.shape_cast %41 : vector<1x1x1x128xf32> to vector<1x128xf32>
    %43 = math.absf %40 : vector<3x128xf32>
    %cst_20 = arith.constant dense<0.000000e+00> : vector<128xf32>
    %44 = vector.multi_reduction <add>, %43, %cst_20 [0] : vector<3x128xf32> to vector<128xf32>
    %45 = vector.shape_cast %44 : vector<128xf32> to vector<1x128xf32>
    %46 = arith.addf %42, %45 : vector<1x128xf32>
    %c0_21 = arith.constant 0 : index
    %c0_22 = arith.constant 0 : index
    %c0_23 = arith.constant 0 : index
    %c0_24 = arith.constant 0 : index
    %47 = vector.load %arg8[%c0_21, %c0_22, %c0_23, %c0_24] : memref<1x1x8x128xf32, #tpu.memory_space<vmem>>, vector<1x1x1x128xf32>
    %48 = vector.shape_cast %47 : vector<1x1x1x128xf32> to vector<1x128xf32>
    %49 = vector.shape_cast %46 : vector<1x128xf32> to vector<1x1x1x128xf32>
    tpu.vector_store %arg8[%c0_21, %c0_22, %c0_23, %c0_24], %49 {strides = array<i32>} : memref<1x1x8x128xf32, #tpu.memory_space<vmem>>, vector<1x1x1x128xf32>,
    %c0_25 = arith.constant 0 : index
    %c0_26 = arith.constant 0 : index
    %c1 = arith.constant 1 : index
    %c0_27 = arith.constant 0 : index
    %50 = vector.load %arg8[%c0_25, %c0_26, %c1, %c0_27] : memref<1x1x8x128xf32, #tpu.memory_space<vmem>>, vector<1x1x1x128xf32>
    %51 = vector.shape_cast %50 : vector<1x1x1x128xf32> to vector<1x128xf32>
    %52 = arith.mulf %40, %40 : vector<3x128xf32>
    %cst_28 = arith.constant dense<0.000000e+00> : vector<128xf32>
    %53 = vector.multi_reduction <add>, %52, %cst_28 [0] : vector<3x128xf32> to vector<128xf32>
    %54 = vector.shape_cast %53 : vector<128xf32> to vector<1x128xf32>
    %55 = arith.addf %51, %54 : vector<1x128xf32>
    %c0_29 = arith.constant 0 : index
    %c0_30 = arith.constant 0 : index
    %c1_31 = arith.constant 1 : index
    %c0_32 = arith.constant 0 : index
    %56 = vector.load %arg8[%c0_29, %c0_30, %c1_31, %c0_32] : memref<1x1x8x128xf32, #tpu.memory_space<vmem>>, vector<1x1x1x128xf32>
    %57 = vector.shape_cast %56 : vector<1x1x1x128xf32> to vector<1x128xf32>
    %58 = vector.shape_cast %55 : vector<1x128xf32> to vector<1x1x1x128xf32>
    tpu.vector_store %arg8[%c0_29, %c0_30, %c1_31, %c0_32], %58 {strides = array<i32>} : memref<1x1x8x128xf32, #tpu.memory_space<vmem>>, vector<1x1x1x128xf32>,
    %c0_33 = arith.constant 0 : index
    %c0_34 = arith.constant 0 : index
    %c0_35 = arith.constant 0 : index
    %59 = vector.load %arg7[%c0_33, %c0_34, %c0_35] : memref<1x2x128xf32, #tpu.memory_space<vmem>>, vector<1x2x128xf32>
    %60 = vector.shape_cast %59 : vector<1x2x128xf32> to vector<2x128xf32>
    %61 = arith.subf %60, %4 : vector<2x128xf32>
    %c0_36 = arith.constant 0 : index
    %c0_37 = arith.constant 0 : index
    %c2 = arith.constant 2 : index
    %c0_38 = arith.constant 0 : index
    %62 = vector.load %arg8[%c0_36, %c0_37, %c2, %c0_38] : memref<1x1x8x128xf32, #tpu.memory_space<vmem>>, vector<1x1x1x128xf32>
    %63 = vector.shape_cast %62 : vector<1x1x1x128xf32> to vector<1x128xf32>
    %64 = arith.mulf %61, %61 : vector<2x128xf32>
    %cst_39 = arith.constant dense<0.000000e+00> : vector<128xf32>
    %65 = vector.multi_reduction <add>, %64, %cst_39 [0] : vector<2x128xf32> to vector<128xf32>
    %66 = vector.shape_cast %65 : vector<128xf32> to vector<1x128xf32>
    %67 = math.sqrt %66 : vector<1x128xf32>
    %68 = arith.addf %63, %67 : vector<1x128xf32>
    %c0_40 = arith.constant 0 : index
    %c0_41 = arith.constant 0 : index
    %c2_42 = arith.constant 2 : index
    %c0_43 = arith.constant 0 : index
    %69 = vector.load %arg8[%c0_40, %c0_41, %c2_42, %c0_43] : memref<1x1x8x128xf32, #tpu.memory_space<vmem>>, vector<1x1x1x128xf32>
    %70 = vector.shape_cast %69 : vector<1x1x1x128xf32> to vector<1x128xf32>
    %71 = vector.shape_cast %68 : vector<1x128xf32> to vector<1x1x1x128xf32>
    tpu.vector_store %arg8[%c0_40, %c0_41, %c2_42, %c0_43], %71 {strides = array<i32>} : memref<1x1x8x128xf32, #tpu.memory_space<vmem>>, vector<1x1x1x128xf32>,
    return
  }
  func.func @transform_0(%arg0: i32, %arg1: i32, %arg2: i32) -> (i32, i32) {
    %c1_i32 = arith.constant 1 : i32
    %0 = arith.muli %arg1, %c1_i32 : i32
    %1 = arith.addi %0, %arg2 : i32
    %c0_i32 = arith.constant 0 : i32
    %c0_i32_0 = arith.constant 0 : i32
    return %c0_i32, %1 : i32, i32
  }
  func.func @transform_1(%arg0: i32, %arg1: i32, %arg2: i32) -> (i32, i32, i32) {
    %c1_i32 = arith.constant 1 : i32
    %0 = arith.muli %arg1, %c1_i32 : i32
    %1 = arith.addi %0, %arg2 : i32
    %c0_i32 = arith.constant 0 : i32
    %c0_i32_0 = arith.constant 0 : i32
    return %arg0, %c0_i32, %1 : i32, i32, i32
  }
  func.func @transform_2(%arg0: i32, %arg1: i32, %arg2: i32) -> (i32, i32, i32) {
    %c0_i32 = arith.constant 0 : i32
    %c0_i32_0 = arith.constant 0 : i32
    %c0_i32_1 = arith.constant 0 : i32
    return %arg0, %c0_i32, %c0_i32_0 : i32, i32, i32
  }
  func.func @transform_3(%arg0: i32, %arg1: i32, %arg2: i32) -> (i32, i32, i32) {
    %c1_i32 = arith.constant 1 : i32
    %0 = arith.muli %arg1, %c1_i32 : i32
    %1 = arith.addi %0, %arg2 : i32
    %c0_i32 = arith.constant 0 : i32
    %c0_i32_0 = arith.constant 0 : i32
    return %arg0, %c0_i32, %1 : i32, i32, i32
  }
  func.func @transform_4(%arg0: i32, %arg1: i32, %arg2: i32) -> (i32, i32, i32) {
    %c1_i32 = arith.constant 1 : i32
    %0 = arith.muli %arg1, %c1_i32 : i32
    %1 = arith.addi %0, %arg2 : i32
    %c0_i32 = arith.constant 0 : i32
    %c0_i32_0 = arith.constant 0 : i32
    return %arg0, %c0_i32, %1 : i32, i32, i32
  }
  func.func @transform_5(%arg0: i32, %arg1: i32, %arg2: i32) -> (i32, i32, i32, i32) {
    %c0_i32 = arith.constant 0 : i32
    %c0_i32_0 = arith.constant 0 : i32
    %c0_i32_1 = arith.constant 0 : i32
    return %arg0, %arg1, %c0_i32, %c0_i32_0 : i32, i32, i32, i32
  }
}

</mosaic_0001>

<bundles_post_ra>
// kernel: tpu_custom_call.1
= control target key start
LH: loop header
LB: loop body
LE: loop exit
PB: predicated region body
PF: predicated region fallthrough
CT: control target
= control target key end

     0   :  { %10 = vsyncpa [#allocation3], 0  ;;  %s1109_s0 = inlined_call_operand.vmem [shape: f32[2,256], index: 0, kind: input, shape index: {}]   ;;  %s1110_s1 = inlined_call_operand.vmem [shape: f32[2,2,256], index: 1, kind: input, shape index: {}]   ;;  %s1111_s2 = inlined_call_operand.vmem [shape: f32[2,48,16], index: 2, kind: input, shape index: {}]   ;;  %s1112_s3 = inlined_call_operand.vmem [shape: f32[2,3,256], index: 3, kind: input, shape index: {}]   ;;  %s1113_s4 = inlined_call_operand.vmem [shape: f32[2,2,256], index: 4, kind: input, shape index: {}]   ;;  %s1114_s5 = inlined_call_operand.hbm [shape: f32[2,2,8,128], index: 5, kind: output, shape index: {}]  }
   0x1   :  { %12 = vsyncpa [#allocation3 + $0x1], 0  ;;  %s951_s18 = smov 0   ;;  %s953_s19 = smov 0  }
   0x2   :  { %s955_s20 = smov 0   ;;  %s957_s21 = smov 0  }
   0x3   :  { %s959_s22 = smov 0   ;;  %s961_s23 = smov 0  }
   0x4   :  { %s963_s24 = smov 0   ;;  %s965_s25 = smov 0  }
   0x5 LB: > { %1118 = sst [smem:[#allocation5_spill]] %s914_s24  ;;  %s718_s26 = sadd.s32 4294967295, %s918_s25   ;;  %s918_s25 = sphi %s965_s25, %s18_s25   ;;  %s914_s24 = sphi %s963_s24, %s1125_s24   ;;  %s910_s23 = sphi %s961_s23, %s1130_s23   ;;  %s906_s22 = sphi %s959_s22, %s1123_s22   ;;  %s902_s21 = sphi %s957_s21, %s1129_s21   ;;  %s898_s20 = sphi %s955_s20, %s1128_s20   ;;  %s894_s19 = sphi %s953_s19, %s1127_s19   ;;  %s890_s18 = sphi %s951_s18, %s1126_s18  }
   0x6   : > { %s719_s27 = sadd.s32 4294967294, %s918_s25   ;;  %s33_s28 = sadd.s32 1, %s910_s23 }
   0x7   : > { %p35_p0 = scmp.ge.s32.totalorder %s33_s28, 2  ;;  %s37_s29 = sadd.s32 1, %s914_s24 }
   0x8   : > { %p200_p1 = scmp.ne.s32.totalorder %s898_s20, %s894_s19  ;;  %p201_p2 = scmp.eq.s32.totalorder %s718_s26, 3 }
   0x9   : > { %s1132_s28 = smov (%p35_p0, %s33_s28), 0  ;;  %s1134_s29 = smov (!%p35_p0, %s37_s29), %s914_s24 }
   0xa   : > { %1119 = sst [smem:[#allocation6_spill]] %s1132_s28  ;;  %s186_s30 = ssub.s32 %s910_s23, %s1132_s28 }
   0xb   : > { %p1002_p3 = por %p201_p2, %p200_p1  ;;  %p39_p4 = scmp.ge.s32.totalorder %s1134_s29, 2 }
   0xc   : > { %p206_p5 = scmp.ne.s32.totalorder %s894_s19, %s890_s18  ;;  %p207_p6 = scmp.eq.s32.totalorder %s719_s27, 3 }
   0xd   : > { %p722_p7 = scmp.ge.s32.totalorder %s918_s25, 1  ;;  %s1136_s29 = smov (%p39_p4, %s1134_s29), 0 }
   0xe   : > { %1121 = sst [smem:[#allocation7_spill]] %s1136_s29  ;;  %p1011_p8 = por %p207_p6, %p206_p5 }
   0xf   : > { %p281_p9 = scmp.lt.s32.totalorder %s918_s25, 5  ;;  %s185_s8 = ssub.s32 %s914_s24, %s1136_s29 }
  0x10   : > { %s190_s9 = sadd.s32 1, %s898_s20  ;;  %s187_s10 = sor.u32 %s186_s30, %s185_s8 }
  0x11   : > { %p282_p10 = pnand %p722_p7, %p281_p9  ;;  %p188_p11 = scmp.eq.s32.totalorder %s187_s10, 0 }
  0x12   : > { %p342_p12 = scmp.lt.s32.totalorder (!%p282_p10), %s902_s21, 1  ;;  %p348_p13 = scmp.lt.s32.totalorder (!%p282_p10), %s906_s22, 1 }
  0x13   : > { %s1020_s11 = scalar_select %p188_p11, %s898_s20, %s190_s9  }
  0x14   : > { %285 = sbr.rel (%p282_p10) target bundleno = 229 (0xe5), region = 40  ;;  %s739_s8 = sshll.u32 (!%p282_p10), %s906_s22, 1 }
  0x19   : > { %v390_v0 = vlaneseq  ;;  %s343_s12 = scalar_select %p342_p12, %s902_s21, 1  ;;  %vm419_vm0 = vcmask 130048   ;;  %vm537_vm1 = vcmask 1041408   ;;  %v920_v57 = vmov 0.0  }
  0x1a   : > { %s349_s13 = scalar_select %p348_p13, %s906_s22, 1  ;;  %vm504_vm4 = vcmask 1041409   ;;  %vm506_vm5 = vcmask 1042434   ;;  %vm512_vm6 = vcmask 1042432  }
  0x1b   : > { %v391_v1 = vshrl.u32 %v390_v0, 7  ;;  %s724_s14 = sshll.u32 %s343_s12, 1 }
  0x1c   : > { %s345_s17 = scalar_lea.vmem %s1109_s0, %s724_s14  ;;  %s725_s26 = sshll.u32 %s349_s13, 1 }
  0x1d   : > { %s1029_s27 = sadd.s32 %s725_s26, %s343_s12  ;;  %v392_v2 = vadd.s32 8, %v391_v1  ;;  %v388_v3 = vld [vmem:[%s345_s17] sm:$0x3]  ;;  %v393_v9 = vcvt.s32.f32 %v391_v1  ;;  %s749_s12 = smul.u32 48, %s349_s13 }
  0x1e   : > { %s726_s30 = sshll.u32 %s1029_s27, 1  ;;  %s729_s16 = sshll.u32 %s1029_s27, 2 }
  0x1f   : > { %s355_s10 = scalar_lea.vmem %s1110_s1, %s726_s30  ;;  %s380_s24 = scalar_lea.vmem %s1113_s4, %s726_s30  ;;  %v394_v7 = vcvt.s32.f32 %v392_v2 }
  0x20   : > { %v387_v4 = vld [vmem:[%s355_s10] sm:$0x3]  ;;  %s361_s28 = scalar_lea.vmem %s1111_s2, %s749_s12  ;;  %s370_s30 = scalar_lea.vmem %s1112_s3, %s729_s16 }
  0x21   : > { %v533_v5 = vld [vmem:[%s380_s24] sm:$0x3]  ;;  %v389_v6 = vadd.f32 %v388_v3, %v387_v4  ;;  %v414_v22 = vld [vmem:[%s361_s28 + $0x8] sm:$0xff]  ;;  %v416_v23 = vld [vmem:[%s361_s28 + $0x18] sm:$0xff]  ;;  %s338_s24 = sand.u32 1, %s894_s19   ;;  %s570_s27 = sadd.s32 %s902_s21, %s739_s8 }
  0x22   : > { %v534_v8 = vsub.f32 %v533_v5, %v387_v4  ;;  %v413_v21 = vld [vmem:[%s361_s28] sm:$0xff]  ;;  %v418_v24 = vld [vmem:[%s361_s28 + $0x28] sm:$0xff]  ;;  %v415_v25 = vld [vmem:[%s361_s28 + $0x10] sm:$0xff]  ;;  %s723_s29 = sshll.u32 %s338_s24, 3  ;;  %s740_s9 = sshll.u32 %s570_s27, 3 }
  0x23   : > { %v404_v10 = vperm.slane %v389_v6, 1  ;;  %v395_v11 = vperm.slane %v389_v6, 0  ;;  %v417_v26 = vld [vmem:[%s361_s28 + $0x20] sm:$0xff]  ;;  %s1050_s13 = scalar_lea.vmem [#allocation2], %s723_s29  ;;  %s572_s22 = scalar_lea.hbm %s1114_s5, %s740_s9 }
  0x24   : > { %v536_v27 = vmul.f32 %v534_v8, %v534_v8  ;;  %386 = vst [vmem:[%s1050_s13] sm:$0xff] %v920_v57  ;;  %s574_s21 = sshll.u32 %s1050_s13, 4  ;;  %s576_s14 = sshll.u32 %s572_s22, 4  ;;  %s575_s21 = int_to_ptr.vmem [resolvable:$true] %s574_s21  ;;  %s577_s14 = int_to_ptr.hbm [resolvable:$true] %s576_s14 }
  0x25   : > { %v406_v12 = vsub.f32 %v394_v7, %v404_v10  ;;  %v405_v13 = vsub.f32 %v393_v9, %v404_v10  ;;  %v396_v14 = vsub.f32 %v393_v9, %v395_v11  ;;  %v397_v33 = vsub.f32 %v394_v7, %v395_v11  ;;  %s560_s15 = scalar_lea.sflag [#allocation3], %s338_s24  ;;  %s838_s28 = sshra.s32 %s577_s14, 4  ;;  %s839_s28 = int_to_ptr.hbm [resolvable:$true] %s838_s28 }
  0x26   : > { %v538_v28 = vsel %vm537_vm1, %v536_v27, 0.0  ;;  %s840_s29 = scalar_lea.hbm %s839_s28, 8  ;;  %s844_s26 = scalar_lea.hbm %s1114_s5, 32 }
  0x27   : > { %v408_v15 = vand.u32 2147483647, %v406_v12  ;;  %v407_v16 = vand.u32 2147483647, %v405_v13  ;;  %v539_v29 = vrot.slane %v538_v28, 4  ;;  %p841_p0 = scmp.ne.s32.totalorder %s839_s28, %s840_s29  ;;  %p845_p4 = scmp.lt.s32.totalorder %s839_s28, %s1114_s5 }
  0x28   : > { %v398_v34 = vand.u32 2147483647, %v396_v14  ;;  %v399_v36 = vand.u32 2147483647, %v397_v33  ;;  %p846_p5 = scmp.lt.s32.totalorder %s844_s26, %s840_s29 }
  0x29   : > { %v410_v17 = vsub.f32 1.0, %v408_v15  ;;  %v409_v18 = vsub.f32 1.0, %v407_v16  ;;  %v540_v30 = vadd.f32 %v539_v29, %v538_v28  ;;  %p842_p1 = pnand %p841_p0, %p1002_p3 }
  0x2a   : > { %v400_v37 = vsub.f32 1.0, %v398_v34  ;;  %v401_v39 = vsub.f32 1.0, %v399_v36  ;;  %p847_p6 = por %p846_p5, %p845_p4 }
  0x2b   : > { %v412_v19 = vmax.f32 %v410_v17, 0.0  ;;  %v411_v20 = vmax.f32 %v409_v18, 0.0  ;;  %v541_v31 = vrot.slane %v540_v30, 2  ;;  %v535_v10 = vld [vmem:[%s1050_s13 + $0x2] sm:$0x1]  ;;  %p843_p2 = pneg %p842_p1 }
  0x2c   : > { %v402_v40 = vmax.f32 %v400_v37, 0.0  ;;  %v403_v41 = vmax.f32 %v401_v39, 0.0 }
  0x2d   : > { %452 = vmatpush.msra.mxu0 %v412_v19  ;;  %743 = vmatpush.msra.mxu1 %v412_v19  ;;  %v542_v32 = vadd.f32 %v541_v31, %v540_v30  ;;  %p848_p7 = pnand %p847_p6, %p843_p2 }
  0x2e   : > { %744 = vmatpush.msra.mxu2 %v412_v19  ;;  %745 = vmatpush.msra.mxu3 %v412_v19 }
  0x2f   : > { %453 = vmatpush.msra.mxu0 %v411_v20  ;;  %746 = vmatpush.msra.mxu1 %v411_v20  ;;  %v543_v35 = vrot.slane %v542_v32, 1 }
  0x30   : > { %747 = vmatpush.msra.mxu2 %v411_v20  ;;  %732 = vmatmul.msk.f32.vlgmr.msra.gmra.mxu0 %vm419_vm0, %v413_v21 }
  0x31   : > { %733 = vmatmul.msk.f32.vlgmr.msra.gmra.mxu1 %vm419_vm0, %v414_v22  ;;  %735 = vmatmul.msk.f32.vlgmr.msra.gmra.mxu2 %vm419_vm0, %v416_v23  ;;  %v544_v38 = vadd.f32 %v543_v35, %v542_v32 }
  0x32   : > { %748 = vmatpush.msra.mxu3 %v411_v20 }
  0x33   : > { %737 = vmatmul.msk.f32.vlgmr.msra.gmra.mxu3 %vm419_vm0, %v418_v24  ;;  %822 = vrsqrt.f32 %v544_v38  ;;  %vm552_vm2 = vcmp.eq.f32.partialorder %v544_v38, inf  ;;  %vm554_vm3 = vcmp.eq.f32.partialorder %v544_v38, 0.0  ;;  %v555_v7 = vand.u32 2147483648, %v544_v38 }
  0x39   : > { %734 = vmatmul.msk.f32.gmra.mxu1 %vm419_vm0, %v415_v25  ;;  %736 = vmatmul.msk.f32.gmra.mxu2 %vm419_vm0, %v417_v26  ;;  %v823_v46 = vpop.eup %822  ;;  %v500_v25 = vld [vmem:[%s370_s30] sm:$0x7] }
  0x3a   : > { %v546_v48 = vmul.f32 %v823_v46, %v544_v38 }
  0x3c   : > { %v547_v51 = vmul.f32 %v823_v46, %v546_v48 }
  0x3e   : > { %v548_v54 = vmul.f32 0.5, %v547_v51 }
  0x40   : > { %v549_v59 = vsub.f32 1.5, %v548_v54 }
  0x42   : > { %v550_v62 = vmul.f32 %v823_v46, %v549_v59 }
  0x44   : > { %v551_v2 = vmul.f32 %v550_v62, %v544_v38 }
  0x46   : > { %v553_v6 = vsel %vm552_vm2, %v544_v38, %v551_v2 }
  0x47   : > { %v556_v11 = vsel %vm554_vm3, %v555_v7, %v553_v6 }
  0x48   : > { %v557_v15 = vadd.f32 %v556_v11, %v535_v10 }
  0x4a   : > { %558 = vst [vmem:[%s1050_s13 + $0x2] sm:$0x1] %v557_v15 }
  0xad   : > { %v455_v42 = vpop.f32.mrf.mxu0 }
  0xae   : > { %v473_v43 = vmul.f32 %v455_v42, %v402_v40  ;;  %v458_v44 = vpop.f32.mrf.mxu1  ;;  %v510_v42 = vld [vmem:[%s1050_s13] sm:$0x1] }
  0xaf   : > { %v474_v45 = vmul.f32 %v458_v44, %v403_v41 }
  0xb1   : > { %v479_v47 = vadd.f32 %v474_v45, %v473_v43  ;;  %v522_v43 = vld [vmem:[%s1050_s13 + $0x1] sm:$0x1] }
  0xb3   : > { %v480_v49 = vrot.slane %v479_v47, 4 }
  0xb4   : > { %v464_v50 = vpop.f32.mrf.mxu2 }
  0xb5   : > { %v481_v52 = vadd.f32 %v480_v49, %v479_v47  ;;  %v476_v55 = vmul.f32 %v464_v50, %v403_v41 }
  0xb6   : > { %v461_v53 = vpop.f32.mrf.mxu1  ;;  %v470_v58 = vpop.f32.mrf.mxu3 }
  0xb7   : > { %v475_v56 = vmul.f32 %v461_v53, %v402_v40  ;;  %v482_v60 = vrot.slane %v481_v52, 2  ;;  %v478_v0 = vmul.f32 %v470_v58, %v403_v41 }
  0xb9   : > { %v486_v61 = vadd.f32 %v476_v55, %v475_v56  ;;  %v483_v3 = vadd.f32 %v482_v60, %v481_v52 }
  0xbb   : > { %v487_v63 = vrot.slane %v486_v61, 4  ;;  %v484_v12 = vrot.slane %v483_v3, 1 }
  0xbc   : > { %v467_v1 = vpop.f32.mrf.mxu2 }
  0xbd   : > { %v488_v4 = vadd.f32 %v487_v63, %v486_v61  ;;  %v477_v5 = vmul.f32 %v467_v1, %v402_v40  ;;  %v485_v18 = vadd.f32 %v484_v12, %v483_v3 }
  0xbf   : > { %v489_v8 = vrot.slane %v488_v4, 2  ;;  %v493_v9 = vadd.f32 %v478_v0, %v477_v5 }
  0xc1   : > { %v490_v13 = vadd.f32 %v489_v8, %v488_v4  ;;  %v494_v14 = vrot.slane %v493_v9, 4 }
  0xc3   : > { %v491_v16 = vrot.slane %v490_v13, 1  ;;  %v495_v17 = vadd.f32 %v494_v14, %v493_v9 }
  0xc5   : > { %v492_v19 = vadd.f32 %v491_v16, %v490_v13  ;;  %v496_v20 = vrot.slane %v495_v17, 2 }
  0xc7   : > { %v505_v21 = vsel %vm504_vm4, %v492_v19, %v485_v18  ;;  %v497_v22 = vadd.f32 %v496_v20, %v495_v17 }
  0xc9   : > { %v498_v23 = vrot.slane %v497_v22, 1 }
  0xcb   : > { %v499_v24 = vadd.f32 %v498_v23, %v497_v22 }
  0xcd   : > { %v507_v26 = vsel %vm506_vm5, %v499_v24, %v505_v21 }
  0xce   : > { %v509_v27 = vsub.f32 %v500_v25, %v507_v26 }
  0xd0   : > { %v511_v28 = vand.u32 2147483647, %v509_v27  ;;  %v523_v29 = vmul.f32 %v509_v27, %v509_v27 }
  0xd2   : > { %v513_v30 = vsel %vm512_vm6, %v511_v28, 0.0  ;;  %v524_v31 = vsel %vm512_vm6, %v523_v29, 0.0 }
  0xd3   : > { %v514_v32 = vrot.slane %v513_v30, 4  ;;  %v525_v33 = vrot.slane %v524_v31, 4 }
  0xd5   : > { %v515_v34 = vadd.f32 %v514_v32, %v513_v30  ;;  %v526_v35 = vadd.f32 %v525_v33, %v524_v31 }
  0xd7   : > { %v516_v36 = vrot.slane %v515_v34, 2  ;;  %v527_v37 = vrot.slane %v526_v35, 2 }
  0xd9   : > { %v517_v38 = vadd.f32 %v516_v36, %v515_v34  ;;  %v528_v39 = vadd.f32 %v527_v37, %v526_v35 }
  0xdb   : > { %v518_v40 = vrot.slane %v517_v38, 1  ;;  %v529_v41 = vrot.slane %v528_v39, 1 }
  0xdd   : > { %v519_v44 = vadd.f32 %v518_v40, %v517_v38  ;;  %v530_v45 = vadd.f32 %v529_v41, %v528_v39 }
  0xdf   : > { %v520_v46 = vadd.f32 %v519_v44, %v510_v42  ;;  %v531_v47 = vadd.f32 %v530_v45, %v522_v43 }
  0xe1   : > { %521 = vst [vmem:[%s1050_s13] sm:$0x1] %v520_v46 }
  0xe2   : > { %532 = vst [vmem:[%s1050_s13 + $0x1] sm:$0x1] %v531_v47 }
  0xe3   : > { %851 = shalt.err (!%p848_p7)
}
  0xe4   : > { %750 = dma.vmem_to_hbm [thread:$0]  (%p1002_p3), %s575_s21, 128, %s577_s14, %s560_s15  }
  0xe5 PF: > { %p756_p9 = scmp.ge.s32.totalorder %s918_s25, 2  ;;  %s588_s24 = sand.u32 1, %s890_s18  }
  0xe6   : > { %s589_s13 = scalar_lea.sflag [#allocation3], %s588_s24 }
  0xe7   : > { %p753_p10 = pnand %p756_p9, %p1011_p8 }
  0xe9   : > { %p754_p11 = pneg %p753_p10 }
  0xeb   : > { %885 = dma.done.wait (%p754_p11), %s589_s13, 128  }
  0xec   : > { %887 = vsyncadd (%p754_p11), %s589_s13, 4294967168  ;;  %s18_s25 = sadd.s32 1, %s918_s25   ;;  %s1123_s22 = sld [smem:[#allocation5_spill]] }
  0xed   : > { %p15_p12 = scmp.ge.s32.totalorder %s18_s25, 6   ;;  %s1124_s6 = sld [smem:[#allocation6_spill]] }
  0xee   : > { %s1125_s24 = sld [smem:[#allocation7_spill]]  ;;  %s1126_s18 = smov %s894_s19 }
  0xef   : > { %s1127_s19 = smov %s898_s20  ;;  %s1128_s20 = smov %s1020_s11 }
  0xf0   : > { %s1129_s21 = smov %s910_s23  ;;  %17 = sbr.rel (!%p15_p12) target bundleno = 5 (0x5), region = 91 }
  0xf3   : > { %s1130_s23 = smov %s1124_s6 }
  0xf5   :  { %595 = vsyncpa [#allocation3], 1 }
  0xf6   :  { %597 = vsyncpa [#allocation3 + $0x1], 1 }

</bundles_post_ra>
